<compile_context>
chip_gen: v7x
topology: tpu7x:2x2x1
jax: 0.10.0
libtpu: 0.0.40
codegen_flags: <defaults>
</compile_context>

<pallas_src>
import math
import functools

import numpy as np
import jax
import jax.numpy as jnp
from jax import lax
from jax.experimental import pallas as pl
from jax.experimental.pallas import tpu as pltpu


def _round_up(x, m):
    return ((x + m - 1) // m) * m


# ----------------------------------------------------------------------------
# Kernel 1: fused bidirectional LSTM layer, streamed over time chunks
# ----------------------------------------------------------------------------
def _blstm_layer_kernel(x_ref, wih_ref, whh_ref, b_ref, h0_ref, c0_ref,
                        o_ref, hN_ref, cN_ref,
                        xp_scr, h_scr, c_scr,
                        *, nchunks, seq_len, mxu_dtype):
    # x_ref  : (S, CHUNK, Bp, H)   input segments for this time chunk
    # wih_ref: (1, S, H, 4H)       input weights for this direction
    # whh_ref: (1, H, 4H)          recurrent weights (gates [i, f, g, o])
    # b_ref  : (1, 1, 4H)          folded b_ih + b_hh
    # h0/c0  : (1, Bp, H)          initial state for this direction
    # o_ref  : (1, CHUNK, Bp, H)   per-step hidden outputs for this chunk
    # hN/cN  : (1, Bp, H)          final states (written each chunk; last wins)
    n_seg, chunk, Bp, H = x_ref.shape
    d = pl.program_id(0)           # 0 = forward, 1 = backward
    ci = pl.program_id(1)          # chunk iteration index
    # Actual time-chunk handled this step (backward walks chunks back-to-front;
    # the BlockSpec index_maps use the same formula).
    c_idx = ci + d * (nchunks - 1 - 2 * ci)
    needs_mask = (nchunks * chunk != seq_len)   # static: ragged padded tail?

    @pl.when(ci == 0)
    def _():
        h_scr[...] = h0_ref[0]
        c_scr[...] = c0_ref[0]

    # ---- Fused input projection: one MXU matmul per segment for the whole
    # ---- chunk, accumulated into the VMEM xp slab (bias folded in). --------
    for s in range(n_seg):
        xs = x_ref[s].astype(mxu_dtype).reshape(chunk * Bp, H)
        contrib = jnp.dot(xs, wih_ref[0, s].astype(mxu_dtype),
                          preferred_element_type=jnp.float32)
        contrib = contrib.reshape(chunk, Bp, 4 * H)
        if s == 0:
            xp_scr[...] = contrib + b_ref[0]
        else:
            xp_scr[...] += contrib

    # ---- Serial recurrence over the chunk (fused 4-gate recurrent matmul) --
    def step_fn(step, carry):
        # local within-chunk time index; flipped for the backward direction
        t = step + d * (chunk - 1 - 2 * step)
        h_prev = h_scr[...]
        gates = xp_scr[t] + jnp.dot(h_prev.astype(mxu_dtype),
                                    whh_ref[0].astype(mxu_dtype),
                                    preferred_element_type=jnp.float32)
        i = jax.nn.sigmoid(gates[:, 0:H])
        f = jax.nn.sigmoid(gates[:, H:2 * H])
        g = jnp.tanh(gates[:, 2 * H:3 * H])
        o = jax.nn.sigmoid(gates[:, 3 * H:4 * H])
        c_new = f * c_scr[...] + i * g
        h_new = o * jnp.tanh(c_new)
        if needs_mask:
            # Padded tail steps must not perturb h/c (keeps hN/cN and the
            # backward direction's "first" steps correct).
            valid = (c_idx * chunk + t) < seq_len
            c_scr[...] = jnp.where(valid, c_new, c_scr[...])
            h_scr[...] = jnp.where(valid, h_new, h_prev)
        else:
            c_scr[...] = c_new
            h_scr[...] = h_new
        o_ref[0, t] = h_new
        return carry

    lax.fori_loop(0, chunk, step_fn, 0)
    hN_ref[0] = h_scr[...]
    cN_ref[0] = c_scr[...]


def lstm_bilayer(x_seg, wih, whh, bias, h0, c0, *, chunk, nchunks, seq_len,
                 mxu_dtype=jnp.float32):
    """One (bi)LSTM layer.

    x_seg: (S, T_pad, Bp, H) input segments (S=1 for layer 0, S=ndir after).
    wih  : (ndir, S, H, 4H), whh: (ndir, H, 4H), bias: (ndir, 1, 4H)
    h0,c0: (ndir, Bp, H)
    Returns out (ndir, T_pad, Bp, H), hN (ndir, Bp, H), cN (ndir, Bp, H).
    """
    S, T_pad, Bp, H = x_seg.shape
    ndir = wih.shape[0]
    kernel = functools.partial(_blstm_layer_kernel, nchunks=nchunks,
                               seq_len=seq_len, mxu_dtype=mxu_dtype)

    def x_map(d, i):   # shared input; backward walks chunks in reverse
        return (0, i + d * (nchunks - 1 - 2 * i), 0, 0)

    def o_map(d, i):
        return (d, i + d * (nchunks - 1 - 2 * i), 0, 0)

    out, hN, cN = pl.pallas_call(
        kernel,
        out_shape=(jax.ShapeDtypeStruct((ndir, T_pad, Bp, H), jnp.float32),
                   jax.ShapeDtypeStruct((ndir, Bp, H), jnp.float32),
                   jax.ShapeDtypeStruct((ndir, Bp, H), jnp.float32)),
        grid_spec=pltpu.PrefetchScalarGridSpec(
            num_scalar_prefetch=0,
            grid=(ndir, nchunks),
            in_specs=[
                pl.BlockSpec((S, chunk, Bp, H), x_map),
                pl.BlockSpec((1, S, H, 4 * H), lambda d, i: (d, 0, 0, 0)),
                pl.BlockSpec((1, H, 4 * H), lambda d, i: (d, 0, 0)),
                pl.BlockSpec((1, 1, 4 * H), lambda d, i: (d, 0, 0)),
                pl.BlockSpec((1, Bp, H), lambda d, i: (d, 0, 0)),
                pl.BlockSpec((1, Bp, H), lambda d, i: (d, 0, 0)),
            ],
            out_specs=(
                pl.BlockSpec((1, chunk, Bp, H), o_map),
                pl.BlockSpec((1, Bp, H), lambda d, i: (d, 0, 0)),
                pl.BlockSpec((1, Bp, H), lambda d, i: (d, 0, 0)),
            ),
            scratch_shapes=[
                pltpu.VMEM((chunk, Bp, 4 * H), jnp.float32),   # xp slab
                pltpu.VMEM((Bp, H), jnp.float32),              # h state
                pltpu.VMEM((Bp, H), jnp.float32),              # c state
            ]),
        compiler_params=pltpu.CompilerParams(
            dimension_semantics=("parallel", "arbitrary")),
    )(x_seg.astype(jnp.float32), wih.astype(jnp.float32),
      whh.astype(jnp.float32), bias.astype(jnp.float32),
      h0.astype(jnp.float32), c0.astype(jnp.float32))
    return out, hN, cN


# ----------------------------------------------------------------------------
# Kernel 2: segmented, M-tiled matmul + bias (final Linear, no concat needed)
# ----------------------------------------------------------------------------
def _mm_seg_bias_kernel(*refs, n_seg, mxu_dtype):
    x_refs = refs[:n_seg]
    w_refs = refs[n_seg:2 * n_seg]
    b_ref = refs[2 * n_seg]
    o_ref = refs[2 * n_seg + 1]
    acc = jnp.dot(x_refs[0][...].astype(mxu_dtype),
                  w_refs[0][...].astype(mxu_dtype),
                  preferred_element_type=jnp.float32)
    for s in range(1, n_seg):
        acc = acc + jnp.dot(x_refs[s][...].astype(mxu_dtype),
                            w_refs[s][...].astype(mxu_dtype),
                            preferred_element_type=jnp.float32)
    o_ref[...] = acc + b_ref[...]


def matmul_bias_seg(xs, ws, b, *, tile_m=512, mxu_dtype=jnp.float32):
    """sum_s xs[s] @ ws[s] + b, tiled over rows (grid axis marked parallel)."""
    M = xs[0].shape[0]
    N = ws[0].shape[1]
    tm = min(tile_m, _round_up(M, 8))
    grid = (pl.cdiv(M, tm),)
    in_specs = ([pl.BlockSpec((tm, x.shape[1]), lambda i: (i, 0)) for x in xs]
                + [pl.BlockSpec(w.shape, lambda i: (0, 0)) for w in ws]
                + [pl.BlockSpec((1, N), lambda i: (0, 0))])
    kernel = functools.partial(_mm_seg_bias_kernel, n_seg=len(xs),
                               mxu_dtype=mxu_dtype)
    return pl.pallas_call(
        kernel,
        out_shape=jax.ShapeDtypeStruct((M, N), jnp.float32),
        grid_spec=pltpu.PrefetchScalarGridSpec(
            num_scalar_prefetch=0,
            grid=grid,
            in_specs=in_specs,
            out_specs=pl.BlockSpec((tm, N), lambda i: (i, 0))),
        compiler_params=pltpu.CompilerParams(
            dimension_semantics=("parallel",)),
    )(*[x.astype(jnp.float32) for x in xs],
      *[w.astype(jnp.float32) for w in ws],
      b.reshape(1, N).astype(jnp.float32))


# ----------------------------------------------------------------------------
# Parameter prep (PyTorch-like init; weights pre-transposed & direction-stacked)
# ----------------------------------------------------------------------------
def init_blstm_params(key, dim, layers=2, bi=True):
    ndir = 2 if bi else 1
    bound = 1.0 / math.sqrt(dim)
    keys = iter(jax.random.split(key, 4 * layers * ndir + 2))

    def unif(shape, b):
        return jax.random.uniform(next(keys), shape, jnp.float32, -b, b)

    lstm = []
    for layer in range(layers):
        n_seg = 1 if layer == 0 else ndir
        in_size = dim * n_seg
        wih_d, whh_d, b_d = [], [], []
        for _ in range(ndir):
            w_ih = unif((4 * dim, in_size), bound)   # PyTorch gate order [i,f,g,o]
            w_hh = unif((4 * dim, dim), bound)
            b_ih = unif((4 * dim,), bound)
            b_hh = unif((4 * dim,), bound)
            wih_d.append(w_ih.T.reshape(n_seg, dim, 4 * dim))  # (S, H, 4H)
            whh_d.append(w_hh.T)                               # (H, 4H)
            b_d.append((b_ih + b_hh).reshape(1, 4 * dim))      # folded biases
        lstm.append(dict(wih=jnp.stack(wih_d, 0),   # (ndir, S, H, 4H)
                         whh=jnp.stack(whh_d, 0),   # (ndir, H, 4H)
                         bias=jnp.stack(b_d, 0)))   # (ndir, 1, 4H)

    linear = None
    if bi:
        kl = 1.0 / math.sqrt(2 * dim)
        w = unif((dim, 2 * dim), kl)
        b = unif((dim,), kl)
        linear = dict(w_t=w.T, b=b)                 # (2H, H)

    return dict(lstm=lstm, linear=linear, ndir=ndir, dim=dim)


# ----------------------------------------------------------------------------
# Forward
# ----------------------------------------------------------------------------
def blstm_forward(params, x, hidden=None, *, chunk_target=64, tile_m=512,
                  mxu_dtype=jnp.float32):
    """x: (T, B, dim) -> (y: (T, B, dim), (h_n, c_n): (layers*ndir, B, dim))."""
    T, B, dim = x.shape
    ndir = params["ndir"]
    layers = len(params["lstm"])
    H = params["dim"]
    assert dim == H

    Bp = _round_up(max(B, 1), 8)             # sublane-dense batch
    chunk = max(1, min(chunk_target, T))     # time-chunk streamed through VMEM
    nchunks = pl.cdiv(T, chunk)
    T_pad = nchunks * chunk

    if hidden is None:
        h0 = jnp.zeros((layers * ndir, Bp, H), jnp.float32)
        c0 = jnp.zeros((layers * ndir, Bp, H), jnp.float32)
    else:
        h0_in, c0_in = hidden
        h0 = jnp.pad(h0_in.astype(jnp.float32), ((0, 0), (0, Bp - B), (0, 0)))
        c0 = jnp.pad(c0_in.astype(jnp.float32), ((0, 0), (0, Bp - B), (0, 0)))

    # Layer-0 input as a single segment; deeper layers consume the previous
    # layer's direction-stacked output directly (no concatenate copy).
    cur = jnp.pad(x.astype(jnp.float32)[None],
                  ((0, 0), (0, T_pad - T), (0, Bp - B), (0, 0)))

    h_list, c_list = [], []
    for li, lp in enumerate(params["lstm"]):
        out, hN, cN = lstm_bilayer(
            cur, lp["wih"], lp["whh"], lp["bias"],
            h0[li * ndir:(li + 1) * ndir], c0[li * ndir:(li + 1) * ndir],
            chunk=chunk, nchunks=nchunks, seq_len=T, mxu_dtype=mxu_dtype)
        h_list.append(hN)
        c_list.append(cN)
        cur = out                              # (ndir, T_pad, Bp, H)

    if params["linear"] is not None:
        xs = [cur[dd].reshape(T_pad * Bp, H) for dd in range(ndir)]
        ws = [params["linear"]["w_t"][dd * H:(dd + 1) * H] for dd in range(ndir)]
        y = matmul_bias_seg(xs, ws, params["linear"]["b"],
                            tile_m=tile_m, mxu_dtype=mxu_dtype)
        y = y.reshape(T_pad, Bp, H)[:T, :B]
    else:
        y = cur[0][:T, :B]

    h_n = jnp.concatenate(h_list, axis=0)[:, :B]
    c_n = jnp.concatenate(c_list, axis=0)[:, :B]
    return y, (h_n, c_n)


# ----------------------------------------------------------------------------
# Pure-JAX reference (same math, for self-check)
# ----------------------------------------------------------------------------
def blstm_reference(params, x, hidden=None):
    T, B, H = x.shape
    ndir = params["ndir"]
    layers = len(params["lstm"])
    hp = lax.Precision.HIGHEST
    if hidden is None:
        h0 = jnp.zeros((layers * ndir, B, H), jnp.float32)
        c0 = jnp.zeros((layers * ndir, B, H), jnp.float32)
    else:
        h0, c0 = hidden

    inp = x.astype(jnp.float32)
    hs, cs = [], []
    for li, lp in enumerate(params["lstm"]):
        outs = []
        for d in range(ndir):
            wih = lp["wih"][d].reshape(-1, 4 * H)
            whh = lp["whh"][d]
            b = lp["bias"][d][0]
            h = h0[li * ndir + d]
            c = c0[li * ndir + d]
            order = range(T - 1, -1, -1) if d == 1 else range(T)
            out_t = [None] * T
            for t in order:
                gates = (jnp.dot(inp[t], wih, precision=hp)
                         + jnp.dot(h, whh, precision=hp) + b)
                i = jax.nn.sigmoid(gates[:, 0:H])
                f = jax.nn.sigmoid(gates[:, H:2 * H])
                g = jnp.tanh(gates[:, 2 * H:3 * H])
                o = jax.nn.sigmoid(gates[:, 3 * H:4 * H])
                c = f * c + i * g
                h = o * jnp.tanh(c)
                out_t[t] = h
            outs.append(jnp.stack(out_t, 0))
            hs.append(h)
            cs.append(c)
        inp = jnp.concatenate(outs, axis=-1)
    if params["linear"] is not None:
        y = (jnp.dot(inp.reshape(T * B, -1), params["linear"]["w_t"], precision=hp)
             + params["linear"]["b"]).reshape(T, B, H)
    else:
        y = inp
    return y, (jnp.stack(hs, 0), jnp.stack(cs, 0))


# ----------------------------------------------------------------------------
if __name__ == "__main__":
    dim, layers, T, B = 32, 2, 8, 2

    key = jax.random.PRNGKey(0)
    kp, kx, kh, kc = jax.random.split(key, 4)
    params = init_blstm_params(kp, dim, layers=layers, bi=True)
    x = jax.random.normal(kx, (T, B, dim), dtype=jnp.float32)

    # 1) default path (single time-chunk), hidden=None
    y, (h_n, c_n) = blstm_forward(params, x)
    y = jax.block_until_ready(y)
    assert y.shape == (T, B, dim), y.shape
    assert h_n.shape == (2 * layers, B, dim), h_n.shape
    assert c_n.shape == (2 * layers, B, dim), c_n.shape
    assert y.dtype == jnp.float32
    assert bool(jnp.all(jnp.isfinite(y)))

    y_ref, (h_ref, c_ref) = blstm_reference(params, x)
    np.testing.assert_allclose(np.asarray(y), np.asarray(y_ref), rtol=1e-4, atol=1e-4)
    np.testing.assert_allclose(np.asarray(h_n), np.asarray(h_ref), rtol=1e-4, atol=1e-4)
    np.testing.assert_allclose(np.asarray(c_n), np.asarray(c_ref), rtol=1e-4, atol=1e-4)

    # 2) multi-chunk streaming path with a ragged (masked) tail: chunk=3, T=8
    y2, (h2, c2) = blstm_forward(params, x, chunk_target=3)
    np.testing.assert_allclose(np.asarray(y2), np.asarray(y_ref), rtol=1e-4, atol=1e-4)
    np.testing.assert_allclose(np.asarray(h2), np.asarray(h_ref), rtol=1e-4, atol=1e-4)
    np.testing.assert_allclose(np.asarray(c2), np.asarray(c_ref), rtol=1e-4, atol=1e-4)

    # 3) user-supplied initial hidden state (PyTorch `hidden` contract)
    h0 = 0.1 * jax.random.normal(kh, (2 * layers, B, dim), dtype=jnp.float32)
    c0 = 0.1 * jax.random.normal(kc, (2 * layers, B, dim), dtype=jnp.float32)
    y3, (h3, c3) = blstm_forward(params, x, hidden=(h0, c0), chunk_target=4)
    y3r, (h3r, c3r) = blstm_reference(params, x, hidden=(h0, c0))
    np.testing.assert_allclose(np.asarray(y3), np.asarray(y3r), rtol=1e-4, atol=1e-4)
    np.testing.assert_allclose(np.asarray(h3), np.asarray(h3r), rtol=1e-4, atol=1e-4)
    np.testing.assert_allclose(np.asarray(c3), np.asarray(c3r), rtol=1e-4, atol=1e-4)

    print("KERNEL_OK")
</pallas_src>

<mosaic_0001>
module attributes {stable_mosaic.version = 11 : i64} {
  func.func @_blstm_layer_kernel(%arg0: i32, %arg1: i32, %arg2: memref<1x8x8x32xf32, #tpu.memory_space<vmem>>, %arg3: memref<1x1x32x128xf32, #tpu.memory_space<vmem>>, %arg4: memref<1x32x128xf32, #tpu.memory_space<vmem>>, %arg5: memref<1x1x128xf32, #tpu.memory_space<vmem>>, %arg6: memref<1x8x32xf32, #tpu.memory_space<vmem>>, %arg7: memref<1x8x32xf32, #tpu.memory_space<vmem>>, %arg8: memref<1x8x8x32xf32, #tpu.memory_space<vmem>>, %arg9: memref<1x8x32xf32, #tpu.memory_space<vmem>>, %arg10: memref<1x8x32xf32, #tpu.memory_space<vmem>>, %arg11: memref<8x8x128xf32, #tpu.memory_space<vmem>>, %arg12: memref<8x32xf32, #tpu.memory_space<vmem>>, %arg13: memref<8x32xf32, #tpu.memory_space<vmem>>) attributes {dimension_semantics = [#tpu.dimension_semantics<parallel>, #tpu.dimension_semantics<arbitrary>], iteration_bounds = array<i64: 2, 1>, scalar_prefetch = 0 : i64, scratch_operands = 3 : i64, tpu.core_type = #tpu.core_type<tc>, window_params = [{transform_indices = @transform_0, window_bounds = array<i64: 1, 8, 8, 32>}, {transform_indices = @transform_1, window_bounds = array<i64: 1, 1, 32, 128>}, {transform_indices = @transform_2, window_bounds = array<i64: 1, 32, 128>}, {transform_indices = @transform_3, window_bounds = array<i64: 1, 1, 128>}, {transform_indices = @transform_4, window_bounds = array<i64: 1, 8, 32>}, {transform_indices = @transform_5, window_bounds = array<i64: 1, 8, 32>}, {transform_indices = @transform_6, window_bounds = array<i64: 1, 8, 8, 32>}, {transform_indices = @transform_7, window_bounds = array<i64: 1, 8, 32>}, {transform_indices = @transform_8, window_bounds = array<i64: 1, 8, 32>}]} {
    %c0_i32 = arith.constant 0 : i32
    %0 = arith.cmpi eq, %arg1, %c0_i32 : i32
    %1 = arith.extui %0 : i1 to i32
    %c0_i32_0 = arith.constant 0 : i32
    %2 = arith.cmpi ne, %1, %c0_i32_0 : i32
    scf.if %2 {
      %c0_26 = arith.constant 0 : index
      %c0_27 = arith.constant 0 : index
      %c0_28 = arith.constant 0 : index
      %25 = vector.load %arg6[%c0_26, %c0_27, %c0_28] : memref<1x8x32xf32, #tpu.memory_space<vmem>>, vector<1x8x32xf32>
      %26 = vector.shape_cast %25 : vector<1x8x32xf32> to vector<8x32xf32>
      %c0_29 = arith.constant 0 : index
      %c0_30 = arith.constant 0 : index
      %27 = vector.load %arg12[%c0_29, %c0_30] : memref<8x32xf32, #tpu.memory_space<vmem>>, vector<8x32xf32>
      tpu.vector_store %arg12[%c0_29, %c0_30], %26 {strides = array<i32>} : memref<8x32xf32, #tpu.memory_space<vmem>>, vector<8x32xf32>,
      %c0_31 = arith.constant 0 : index
      %c0_32 = arith.constant 0 : index
      %c0_33 = arith.constant 0 : index
      %28 = vector.load %arg7[%c0_31, %c0_32, %c0_33] : memref<1x8x32xf32, #tpu.memory_space<vmem>>, vector<1x8x32xf32>
      %29 = vector.shape_cast %28 : vector<1x8x32xf32> to vector<8x32xf32>
      %c0_34 = arith.constant 0 : index
      %c0_35 = arith.constant 0 : index
      %30 = vector.load %arg13[%c0_34, %c0_35] : memref<8x32xf32, #tpu.memory_space<vmem>>, vector<8x32xf32>
      tpu.vector_store %arg13[%c0_34, %c0_35], %29 {strides = array<i32>} : memref<8x32xf32, #tpu.memory_space<vmem>>, vector<8x32xf32>,
    } else {
    }
    %c0 = arith.constant 0 : index
    %c0_1 = arith.constant 0 : index
    %c0_2 = arith.constant 0 : index
    %c0_3 = arith.constant 0 : index
    %3 = vector.load %arg2[%c0, %c0_1, %c0_2, %c0_3] : memref<1x8x8x32xf32, #tpu.memory_space<vmem>>, vector<1x8x8x32xf32>
    %4 = vector.shape_cast %3 : vector<1x8x8x32xf32> to vector<8x8x32xf32>
    %5 = vector.shape_cast %4 : vector<8x8x32xf32> to vector<64x32xf32>
    %c0_4 = arith.constant 0 : index
    %c0_5 = arith.constant 0 : index
    %c0_6 = arith.constant 0 : index
    %c0_7 = arith.constant 0 : index
    %6 = vector.load %arg3[%c0_4, %c0_5, %c0_6, %c0_7] : memref<1x1x32x128xf32, #tpu.memory_space<vmem>>, vector<1x1x32x128xf32>
    %7 = vector.shape_cast %6 : vector<1x1x32x128xf32> to vector<32x128xf32>
    %cst = arith.constant dense<0.000000e+00> : vector<64x128xf32>
    %8 = tpu.matmul %5, %7, %cst {dimension_numbers = #tpu.dot_dimension_numbers<[1], [0], [0], [1], [0, 0, 1, 1], [], []>} : vector<64x32xf32>, vector<32x128xf32>, vector<64x128xf32> -> vector<64x128xf32>
    %9 = vector.shape_cast %8 : vector<64x128xf32> to vector<8x8x128xf32>
    %c0_8 = arith.constant 0 : index
    %c0_9 = arith.constant 0 : index
    %c0_10 = arith.constant 0 : index
    %10 = vector.load %arg5[%c0_8, %c0_9, %c0_10] : memref<1x1x128xf32, #tpu.memory_space<vmem>>, vector<1x1x128xf32>
    %11 = vector.shape_cast %10 : vector<1x1x128xf32> to vector<1x128xf32>
    %12 = vector.shape_cast %11 : vector<1x128xf32> to vector<1x1x128xf32>
    %13 = vector.broadcast %12 : vector<1x1x128xf32> to vector<8x8x128xf32>
    %14 = arith.addf %9, %13 : vector<8x8x128xf32>
    %c0_11 = arith.constant 0 : index
    %c0_12 = arith.constant 0 : index
    %c0_13 = arith.constant 0 : index
    %15 = vector.load %arg11[%c0_11, %c0_12, %c0_13] : memref<8x8x128xf32, #tpu.memory_space<vmem>>, vector<8x8x128xf32>
    tpu.vector_store %arg11[%c0_11, %c0_12, %c0_13], %14 {strides = array<i32>} : memref<8x8x128xf32, #tpu.memory_space<vmem>>, vector<8x8x128xf32>,
    %c0_i32_14 = arith.constant 0 : i32
    %c8_i32 = arith.constant 8 : i32
    %16 = arith.addi %c0_i32_14, %c8_i32 : i32
    %c1_i32 = arith.constant 1 : i32
    scf.for %arg14 = %c0_i32_14 to %16 step %c1_i32  : i32 {
      %c2_i32 = arith.constant 2 : i32
      %25 = arith.muli %c2_i32, %arg14 : i32
      %c7_i32 = arith.constant 7 : i32
      %26 = arith.subi %c7_i32, %25 : i32
      %27 = arith.muli %arg0, %26 : i32
      %28 = arith.addi %arg14, %27 : i32
      %c0_26 = arith.constant 0 : index
      %c0_27 = arith.constant 0 : index
      %29 = vector.load %arg12[%c0_26, %c0_27] : memref<8x32xf32, #tpu.memory_space<vmem>>, vector<8x32xf32>
      %30 = arith.index_cast %28 : i32 to index
      %c0_28 = arith.constant 0 : index
      %c0_29 = arith.constant 0 : index
      %31 = vector.load %arg11[%30, %c0_28, %c0_29] : memref<8x8x128xf32, #tpu.memory_space<vmem>>, vector<1x8x128xf32>
      %32 = vector.shape_cast %31 : vector<1x8x128xf32> to vector<8x128xf32>
      %c0_30 = arith.constant 0 : index
      %c0_31 = arith.constant 0 : index
      %c0_32 = arith.constant 0 : index
      %33 = vector.load %arg4[%c0_30, %c0_31, %c0_32] : memref<1x32x128xf32, #tpu.memory_space<vmem>>, vector<1x32x128xf32>
      %34 = vector.shape_cast %33 : vector<1x32x128xf32> to vector<32x128xf32>
      %cst_33 = arith.constant dense<0.000000e+00> : vector<8x128xf32>
      %35 = tpu.matmul %29, %34, %cst_33 {dimension_numbers = #tpu.dot_dimension_numbers<[1], [0], [0], [1], [0, 0, 1, 1], [], []>} : vector<8x32xf32>, vector<32x128xf32>, vector<8x128xf32> -> vector<8x128xf32>
      %36 = arith.addf %32, %35 : vector<8x128xf32>
      %37 = vector.extract_strided_slice %36 {offsets = [0, 0], sizes = [8, 32], strides = [1, 1]} : vector<8x128xf32> to vector<8x32xf32>
      %38 = arith.negf %37 : vector<8x32xf32>
      %39 = math.exp %38 : vector<8x32xf32>
      %cst_34 = arith.constant 1.000000e+00 : f32
      %40 = vector.broadcast %cst_34 : f32 to vector<8x32xf32>
      %41 = arith.addf %40, %39 : vector<8x32xf32>
      %42 = arith.divf %40, %41 : vector<8x32xf32>
      %43 = vector.extract_strided_slice %36 {offsets = [0, 32], sizes = [8, 32], strides = [1, 1]} : vector<8x128xf32> to vector<8x32xf32>
      %44 = arith.negf %43 : vector<8x32xf32>
      %45 = math.exp %44 : vector<8x32xf32>
      %cst_35 = arith.constant 1.000000e+00 : f32
      %46 = vector.broadcast %cst_35 : f32 to vector<8x32xf32>
      %47 = arith.addf %46, %45 : vector<8x32xf32>
      %48 = arith.divf %46, %47 : vector<8x32xf32>
      %49 = vector.extract_strided_slice %36 {offsets = [0, 64], sizes = [8, 32], strides = [1, 1]} : vector<8x128xf32> to vector<8x32xf32>
      %50 = math.tanh %49 : vector<8x32xf32>
      %51 = vector.extract_strided_slice %36 {offsets = [0, 96], sizes = [8, 32], strides = [1, 1]} : vector<8x128xf32> to vector<8x32xf32>
      %52 = arith.negf %51 : vector<8x32xf32>
      %53 = math.exp %52 : vector<8x32xf32>
      %cst_36 = arith.constant 1.000000e+00 : f32
      %54 = vector.broadcast %cst_36 : f32 to vector<8x32xf32>
      %55 = arith.addf %54, %53 : vector<8x32xf32>
      %56 = arith.divf %54, %55 : vector<8x32xf32>
      %c0_37 = arith.constant 0 : index
      %c0_38 = arith.constant 0 : index
      %57 = vector.load %arg13[%c0_37, %c0_38] : memref<8x32xf32, #tpu.memory_space<vmem>>, vector<8x32xf32>
      %58 = arith.mulf %48, %57 : vector<8x32xf32>
      %59 = arith.mulf %42, %50 : vector<8x32xf32>
      %60 = arith.addf %58, %59 : vector<8x32xf32>
      %61 = math.tanh %60 : vector<8x32xf32>
      %62 = arith.mulf %56, %61 : vector<8x32xf32>
      %c0_39 = arith.constant 0 : index
      %c0_40 = arith.constant 0 : index
      %63 = vector.load %arg13[%c0_39, %c0_40] : memref<8x32xf32, #tpu.memory_space<vmem>>, vector<8x32xf32>
      tpu.vector_store %arg13[%c0_39, %c0_40], %60 {strides = array<i32>} : memref<8x32xf32, #tpu.memory_space<vmem>>, vector<8x32xf32>,
      %c0_41 = arith.constant 0 : index
      %c0_42 = arith.constant 0 : index
      %64 = vector.load %arg12[%c0_41, %c0_42] : memref<8x32xf32, #tpu.memory_space<vmem>>, vector<8x32xf32>
      tpu.vector_store %arg12[%c0_41, %c0_42], %62 {strides = array<i32>} : memref<8x32xf32, #tpu.memory_space<vmem>>, vector<8x32xf32>,
      %c0_43 = arith.constant 0 : index
      %65 = arith.index_cast %28 : i32 to index
      %c0_44 = arith.constant 0 : index
      %c0_45 = arith.constant 0 : index
      %66 = vector.load %arg8[%c0_43, %65, %c0_44, %c0_45] : memref<1x8x8x32xf32, #tpu.memory_space<vmem>>, vector<1x1x8x32xf32>
      %67 = vector.shape_cast %66 : vector<1x1x8x32xf32> to vector<8x32xf32>
      %68 = vector.shape_cast %62 : vector<8x32xf32> to vector<1x1x8x32xf32>
      tpu.vector_store %arg8[%c0_43, %65, %c0_44, %c0_45], %68 {strides = array<i32>} : memref<1x8x8x32xf32, #tpu.memory_space<vmem>>, vector<1x1x8x32xf32>,
    }
    %c8_i32_15 = arith.constant 8 : i32
    %c0_16 = arith.constant 0 : index
    %c0_17 = arith.constant 0 : index
    %17 = vector.load %arg12[%c0_16, %c0_17] : memref<8x32xf32, #tpu.memory_space<vmem>>, vector<8x32xf32>
    %c0_18 = arith.constant 0 : index
    %c0_19 = arith.constant 0 : index
    %c0_20 = arith.constant 0 : index
    %18 = vector.load %arg9[%c0_18, %c0_19, %c0_20] : memref<1x8x32xf32, #tpu.memory_space<vmem>>, vector<1x8x32xf32>
    %19 = vector.shape_cast %18 : vector<1x8x32xf32> to vector<8x32xf32>
    %20 = vector.shape_cast %17 : vector<8x32xf32> to vector<1x8x32xf32>
    tpu.vector_store %arg9[%c0_18, %c0_19, %c0_20], %20 {strides = array<i32>} : memref<1x8x32xf32, #tpu.memory_space<vmem>>, vector<1x8x32xf32>,
    %c0_21 = arith.constant 0 : index
    %c0_22 = arith.constant 0 : index
    %21 = vector.load %arg13[%c0_21, %c0_22] : memref<8x32xf32, #tpu.memory_space<vmem>>, vector<8x32xf32>
    %c0_23 = arith.constant 0 : index
    %c0_24 = arith.constant 0 : index
    %c0_25 = arith.constant 0 : index
    %22 = vector.load %arg10[%c0_23, %c0_24, %c0_25] : memref<1x8x32xf32, #tpu.memory_space<vmem>>, vector<1x8x32xf32>
    %23 = vector.shape_cast %22 : vector<1x8x32xf32> to vector<8x32xf32>
    %24 = vector.shape_cast %21 : vector<8x32xf32> to vector<1x8x32xf32>
    tpu.vector_store %arg10[%c0_23, %c0_24, %c0_25], %24 {strides = array<i32>} : memref<1x8x32xf32, #tpu.memory_space<vmem>>, vector<1x8x32xf32>,
    return
  }
  func.func @transform_0(%arg0: i32, %arg1: i32) -> (i32, i32, i32, i32) {
    %c2_i32 = arith.constant 2 : i32
    %0 = arith.muli %c2_i32, %arg1 : i32
    %c0_i32 = arith.constant 0 : i32
    %1 = arith.subi %c0_i32, %0 : i32
    %2 = arith.muli %arg0, %1 : i32
    %3 = arith.addi %arg1, %2 : i32
    %c0_i32_0 = arith.constant 0 : i32
    %c0_i32_1 = arith.constant 0 : i32
    %c0_i32_2 = arith.constant 0 : i32
    %c0_i32_3 = arith.constant 0 : i32
    return %c0_i32_0, %3, %c0_i32_1, %c0_i32_2 : i32, i32, i32, i32
  }
  func.func @transform_1(%arg0: i32, %arg1: i32) -> (i32, i32, i32, i32) {
    %c0_i32 = arith.constant 0 : i32
    %c0_i32_0 = arith.constant 0 : i32
    %c0_i32_1 = arith.constant 0 : i32
    %c0_i32_2 = arith.constant 0 : i32
    return %arg0, %c0_i32, %c0_i32_0, %c0_i32_1 : i32, i32, i32, i32
  }
  func.func @transform_2(%arg0: i32, %arg1: i32) -> (i32, i32, i32) {
    %c0_i32 = arith.constant 0 : i32
    %c0_i32_0 = arith.constant 0 : i32
    %c0_i32_1 = arith.constant 0 : i32
    return %arg0, %c0_i32, %c0_i32_0 : i32, i32, i32
  }
  func.func @transform_3(%arg0: i32, %arg1: i32) -> (i32, i32, i32) {
    %c0_i32 = arith.constant 0 : i32
    %c0_i32_0 = arith.constant 0 : i32
    %c0_i32_1 = arith.constant 0 : i32
    return %arg0, %c0_i32, %c0_i32_0 : i32, i32, i32
  }
  func.func @transform_4(%arg0: i32, %arg1: i32) -> (i32, i32, i32) {
    %c0_i32 = arith.constant 0 : i32
    %c0_i32_0 = arith.constant 0 : i32
    %c0_i32_1 = arith.constant 0 : i32
    return %arg0, %c0_i32, %c0_i32_0 : i32, i32, i32
  }
  func.func @transform_5(%arg0: i32, %arg1: i32) -> (i32, i32, i32) {
    %c0_i32 = arith.constant 0 : i32
    %c0_i32_0 = arith.constant 0 : i32
    %c0_i32_1 = arith.constant 0 : i32
    return %arg0, %c0_i32, %c0_i32_0 : i32, i32, i32
  }
  func.func @transform_6(%arg0: i32, %arg1: i32) -> (i32, i32, i32, i32) {
    %c2_i32 = arith.constant 2 : i32
    %0 = arith.muli %c2_i32, %arg1 : i32
    %c0_i32 = arith.constant 0 : i32
    %1 = arith.subi %c0_i32, %0 : i32
    %2 = arith.muli %arg0, %1 : i32
    %3 = arith.addi %arg1, %2 : i32
    %c0_i32_0 = arith.constant 0 : i32
    %c0_i32_1 = arith.constant 0 : i32
    %c0_i32_2 = arith.constant 0 : i32
    return %arg0, %3, %c0_i32_0, %c0_i32_1 : i32, i32, i32, i32
  }
  func.func @transform_7(%arg0: i32, %arg1: i32) -> (i32, i32, i32) {
    %c0_i32 = arith.constant 0 : i32
    %c0_i32_0 = arith.constant 0 : i32
    %c0_i32_1 = arith.constant 0 : i32
    return %arg0, %c0_i32, %c0_i32_0 : i32, i32, i32
  }
  func.func @transform_8(%arg0: i32, %arg1: i32) -> (i32, i32, i32) {
    %c0_i32 = arith.constant 0 : i32
    %c0_i32_0 = arith.constant 0 : i32
    %c0_i32_1 = arith.constant 0 : i32
    return %arg0, %c0_i32, %c0_i32_0 : i32, i32, i32
  }
}

</mosaic_0001>

<bundles_post_ra>
// kernel: tpu_custom_call.1
= control target key start
LH: loop header
LB: loop body
LE: loop exit
PB: predicated region body
PF: predicated region fallthrough
CT: control target
= control target key end

     0   :  { %s2157_s0 = inlined_call_operand.hbm [shape: f32[1,8,8,32], index: 0, kind: input, shape index: {}]   ;;  %s2158_s1 = inlined_call_operand.hbm [shape: f32[2,1,32,128], index: 1, kind: input, shape index: {}]   ;;  %s2159_s2 = inlined_call_operand.hbm [shape: f32[2,32,128], index: 2, kind: input, shape index: {}]   ;;  %s2160_s3 = inlined_call_operand.vmem [shape: f32[2,1,128], index: 3, kind: input, shape index: {}]   ;;  %s2161_s4 = inlined_call_operand.hbm [shape: f32[2,8,32], index: 4, kind: input, shape index: {}]   ;;  %s2162_s5 = inlined_call_operand.vmem [shape: f32[2,8,32], index: 5, kind: input, shape index: {}]   ;;  %s2163_s6 = inlined_call_operand.hbm [shape: f32[2,8,8,32], index: 6, kind: output, shape index: {0}]   ;;  %s2164_s7 = inlined_call_operand.hbm [shape: f32[2,8,32], index: 7, kind: output, shape index: {1}]   ;;  %s2165_s8 = inlined_call_operand.hbm [shape: f32[2,8,32], index: 8, kind: output, shape index: {2}]  }
   0x1   :  { %2183 = sst [smem:[#allocation27_spill]] %s2158_s1 }
   0x2   :  { %2184 = sst [smem:[#allocation28_spill]] %s2159_s2 }
   0x3   :  { %2185 = sst [smem:[#allocation29_spill]] %s2163_s6 }
   0x4   :  { %14 = vsyncpa [#allocation6], 0 }
   0x5   :  { %16 = vsyncpa [#allocation6 + $0x1], 0 }
   0x6   :  { %17 = vsyncpa [#allocation9], 0 }
   0x7   :  { %19 = vsyncpa [#allocation9 + $0x1], 0 }
   0x8   :  { %20 = vsyncpa [#allocation12], 0 }
   0x9   :  { %22 = vsyncpa [#allocation12 + $0x1], 0 }
   0xa   :  { %23 = vsyncpa [#allocation7], 0 }
   0xb   :  { %25 = vsyncpa [#allocation7 + $0x1], 0 }
   0xc   :  { %26 = vsyncpa [#allocation15], 0 }
   0xd   :  { %28 = vsyncpa [#allocation15 + $0x1], 0  ;;  %s1714_s27 = smov 0   ;;  %s1716_s28 = smov 0  }
   0xe   :  { %s1718_s29 = smov 0   ;;  %s1720_s30 = smov 0  }
   0xf   :  { %s1722_s9 = smov 0   ;;  %s1724_s10 = smov 0  }
  0x10 LB: > { %2186 = sst [smem:[#allocation22_spill]] %s1626_s27  ;;  %s1745_s11 = sadd.s32 4294967295, %s1646_s10   ;;  %s1646_s10 = sphi %s1724_s10, %s34_s10   ;;  %s1642_s9 = sphi %s1722_s9, %s2224_s9   ;;  %s1638_s30 = sphi %s1720_s30, %s2223_s30   ;;  %s1634_s29 = sphi %s1718_s29, %s2219_s29   ;;  %s1630_s28 = sphi %s1716_s28, %s2222_s28   ;;  %s1626_s27 = sphi %s1714_s27, %s2221_s27  }
  0x11   : > { %2187 = sst [smem:[#allocation23_spill]] %s1634_s29  ;;  %s2166_s12 = sadd.s32 4294967294, %s1646_s10  }
  0x12   : > { %s46_s13 = sadd.s32 1, %s1642_s9  ;;  %s87_s14 = sadd.s32 1, %s1634_s29 }
  0x13   : > { %p48_p0 = scmp.ge.s32.totalorder %s46_s13, 2  ;;  %p94_p1 = scmp.ne.s32.totalorder %s1634_s29, %s1630_s28 }
  0x14   : > { %p2174_p2 = scmp.eq.s32.totalorder %s1646_s10, 0  ;;  %p100_p3 = scmp.ne.s32.totalorder %s1630_s28, %s1626_s27 }
  0x15   : > { %s2226_s13 = smov (%p48_p0, %s46_s13), 0  ;;  %p2172_p5 = scmp.eq.s32.totalorder %s1745_s11, 0 }
  0x16   : > { %2188 = sst [smem:[#allocation24_spill]] %s2226_s13  ;;  %p1759_p4 = por %p2174_p2, %p94_p1 }
  0x17   : > { %s84_s16 = ssub.s32 %s1642_s9, %s2226_s13  ;;  %p238_p6 = scmp.eq.s32.totalorder %s1745_s11, 1 }
  0x18   : > { %p85_p7 = scmp.eq.s32.totalorder %s84_s16, 0  ;;  %p1769_p8 = por %p2172_p5, %p100_p3 }
  0x19   : > { %p1773_p9 = por %p238_p6, %p94_p1  ;;  %p244_p10 = scmp.eq.s32.totalorder %s2166_s12, 1 }
  0x1a   : > { %s2190_s17 = scalar_select %p1769_p8, 1, 0 }
  0x1b   : > { %s2191_s18 = scalar_select %p1773_p9, 1, 0 }
  0x1c   : > { %s1780_s19 = scalar_select %p85_p7, %s1634_s29, %s87_s14  }
  0x1d   : > { %p1782_p11 = por %p244_p10, %p100_p3  ;;  %p2173_p13 = scmp.lt.s32.totalorder %s1646_s10, 2 }
  0x1e   : > { %2192 = sst [smem:[#allocation25_spill]] %s1780_s19  ;;  %s341_s21 = sand.u32 1, %s1646_s10  }
  0x1f   : > { %s2193_s20 = scalar_select %p1782_p11, 1, 0 }
  0x20   : > { %s1790_s22 = sand.u32 1, %s1634_s29   ;;  %s1187_s24 = sshll.u32 %s1642_s9, 9 }
  0x21   : > { %2194 = sst [smem:[#allocation26_spill]] %s2193_s20  ;;  %s1148_s23 = sshll.u32 %s1790_s22, 5 }
  0x22   : > { %s2195_s1 = sld [smem:[#allocation27_spill]]  ;;  %s345_s14 = scalar_lea.vmem [#allocation8], %s1148_s23 }
  0x23   : > { %s352_s12 = sshll.u32 %s345_s14, 4  ;;  %p1805_p0 = pnand %p2173_p13, %p1759_p4  ;;  %s1799_s12 = int_to_ptr.vmem [resolvable:$true] %s352_s12 }
  0x24   : > { %s2197_s2 = sld [smem:[#allocation28_spill]]  ;;  %s1814_s26 = scalar_lea.vmem [#allocation10], %s1148_s23 }
  0x25   : > { %s2196_s13 = scalar_select %p1805_p0, 1, 0 }
  0x26   : > { %s373_s20 = sshll.u32 %s1814_s26, 4  ;;  %s1817_s14 = scalar_lea.sflag [#allocation9], %s341_s21  ;;  %s1852_s20 = int_to_ptr.vmem [resolvable:$true] %s373_s20 }
  0x27   : > { %p1823_p3 = pneg %p1805_p0 }
  0x28   : > { %s1797_s16 = scalar_lea.hbm %s2195_s1, %s1187_s24  ;;  %s1379_s23 = scalar_lea.hbm %s2195_s1, 1024 }
  0x29   : > { %s1374_s27 = scalar_lea.hbm %s1797_s16, 512  ;;  %p1380_p7 = scmp.lt.u32.totalorder %s1797_s16, %s2195_s1 }
  0x2a   : > { %s1812_s25 = scalar_lea.hbm %s2197_s2, %s1187_s24  ;;  %p1375_p1 = scmp.ne.s32.totalorder %s1797_s16, %s1374_s27 }
  0x2b   : > { %p1381_p10 = scmp.lt.u32.totalorder %s1379_s23, %s1374_s27  ;;  %p1383_p5 = scmp.lt.u32.totalorder %s1374_s27, %s1797_s16 }
  0x2c   : > { %p1377_p4 = pnand %p1823_p3, %p1375_p1 }
  0x2d   : > { %p1382_p12 = por %p1381_p10, %p1380_p7 }
  0x2e   : > { %p1378_p6 = pneg %p1377_p4 }
  0x2f   : > { %p1384_p13 = por %p1383_p5, %p1382_p12 }
  0x31   : > { %p1385_p2 = pnand %p1384_p13, %p1378_p6 }
  0x33   : > { %1388 = shalt.err (!%p1385_p2)
}
  0x34   : > { %s1389_s21 = scalar_lea.vmem %s1799_s12, 512  ;;  %s1652_s29 = smov [#allocation8]  }
  0x35   : > { %p1390_p1 = scmp.ne.s32.totalorder %s1799_s12, %s1389_s21  ;;  %s1394_s19 = sshll.u32 %s1652_s29, 4  ;;  %s1395_s19 = int_to_ptr.vmem [resolvable:$false] %s1394_s19 }
  0x36   : > { %s1396_s6 = scalar_lea.vmem %s1395_s19, 1024  ;;  %p1397_p9 = scmp.lt.s32.totalorder %s1799_s12, %s1395_s19 }
  0x37   : > { %p1392_p4 = pnand %p1390_p1, %p1823_p3  ;;  %p1398_p8 = scmp.lt.s32.totalorder %s1396_s6, %s1389_s21 }
  0x39   : > { %p1393_p11 = pneg %p1392_p4  ;;  %p1399_p7 = por %p1398_p8, %p1397_p9 }
  0x3b   : > { %p1400_p10 = pnand %p1399_p7, %p1393_p11 }
  0x3d   : > { %1403 = shalt.err (!%p1400_p10)
}
  0x3e   : > { %s2177_s27 = smov 128   ;;  %s2179_s23 = smov 8  }
  0x3f   : > { %1278 = dma.hbm_to_vmem [thread:$0]  (!%p1805_p0), %s1797_s16, 512, %s1799_s12, %s1817_s14, %s2177_s27, %s2177_s27, %s2179_s23  }
  0x40   : > { %p1156_p2 = scmp.ge.s32.totalorder %s1646_s10, 1  ;;  %p412_p5 = scmp.lt.s32.totalorder %s1646_s10, 3 }
  0x41   : > { %s1655_s21 = smov [#allocation5]   ;;  %p2200_p9 = scmp.eq.s32.totalorder %s1646_s10, 0 }
  0x42   : > { %p1856_p8 = pnand %p1156_p2, %p412_p5  ;;  %s331_s29 = sshll.u32 %s1655_s21, 4  ;;  %s1860_s29 = int_to_ptr.vmem [resolvable:$true] %s331_s29 }
  0x43   : > { %p2201_p11 = scmp.lt.s32.totalorder %s1646_s10, 2  ;;  %s1404_s12 = scalar_lea.hbm %s1812_s25, 512 }
  0x44   : > { %s2199_s24 = scalar_select %p1856_p8, 1, 0 }
  0x45   : > { %p1866_p12 = pnand %p2201_p11, %p2200_p9  ;;  %p1405_p13 = scmp.ne.s32.totalorder %s1812_s25, %s1404_s12 }
  0x46   : > { %s1409_s6 = scalar_lea.hbm %s2197_s2, 1024  ;;  %p1410_p4 = scmp.lt.u32.totalorder %s1812_s25, %s2197_s2 }
  0x47   : > { %s2202_s19 = scalar_select %p1866_p12, 1, 0 }
  0x48   : > { %p1407_p6 = pnand %p1405_p13, %p1823_p3  ;;  %p1411_p7 = scmp.lt.u32.totalorder %s1409_s6, %s1404_s12 }
  0x49   : > { %p1413_p2 = scmp.lt.u32.totalorder %s1404_s12, %s1812_s25 }
  0x4a   : > { %p1408_p1 = pneg %p1407_p6  ;;  %p1412_p10 = por %p1411_p7, %p1410_p4 }
  0x4c   : > { %p1414_p5 = por %p1413_p2, %p1412_p10 }
  0x4e   : > { %p1415_p9 = pnand %p1414_p5, %p1408_p1 }
  0x50   : > { %1418 = shalt.err (!%p1415_p9)
}
  0x51   : > { %s1419_s21 = scalar_lea.vmem %s1852_s20, 512  ;;  %s1656_s16 = smov [#allocation10]  }
  0x52   : > { %p1420_p11 = scmp.ne.s32.totalorder %s1852_s20, %s1419_s21  ;;  %s1424_s26 = sshll.u32 %s1656_s16, 4  ;;  %s1425_s26 = int_to_ptr.vmem [resolvable:$false] %s1424_s26 }
  0x53   : > { %s1426_s27 = scalar_lea.vmem %s1425_s26, 1024  ;;  %p1427_p8 = scmp.lt.s32.totalorder %s1852_s20, %s1425_s26 }
  0x54   : > { %p1422_p13 = pnand %p1420_p11, %p1823_p3  ;;  %p1428_p12 = scmp.lt.s32.totalorder %s1426_s27, %s1419_s21 }
  0x56   : > { %p1423_p6 = pneg %p1422_p13  ;;  %p1429_p4 = por %p1428_p12, %p1427_p8 }
  0x58   : > { %p1430_p7 = pnand %p1429_p4, %p1423_p6 }
  0x5a   : > { %1433 = shalt.err (!%p1430_p7)
}
  0x5b   : > { %s2203_s23 = smov 8   ;;  %s2204_s12 = smov 128  }
  0x5c   : > { %1281 = dma.hbm_to_vmem [thread:$0]  (!%p1805_p0), %s1812_s25, 512, %s1852_s20, %s1817_s14, %s2204_s12, %s2204_s12, %s2203_s23  }
  0x5d   : > { %s1434_s16 = scalar_lea.hbm %s2157_s0, 1024  ;;  %p2205_p12 = scmp.ne.s32.totalorder %s2202_s19, 0 }
  0x5e   : > { %p1435_p8 = scmp.ne.s32.totalorder %s2157_s0, %s1434_s16  ;;  %p1441_p5 = scmp.lt.u32.totalorder %s1434_s16, %s2157_s0 }
  0x5f   : > { %p1436_p1 = pneg %p2205_p12 }
  0x61   : > { %p1437_p10 = pnand %p1436_p1, %p1435_p8 }
  0x63   : > { %p1438_p2 = pneg %p1437_p10 }
  0x65   : > { %p1443_p9 = pnand %p1441_p5, %p1438_p2 }
  0x67   : > { %1446 = shalt.err (!%p1443_p9)
}
  0x68   : > { %s1447_s1 = scalar_lea.vmem %s1860_s29, 1024  ;;  %s1454_s2 = scalar_lea.vmem %s1860_s29, 2048 }
  0x69   : > { %p1448_p11 = scmp.ne.s32.totalorder %s1860_s29, %s1447_s1  ;;  %p1455_p4 = scmp.lt.s32.totalorder %s1860_s29, %s1860_s29 }
  0x6a   : > { %p1456_p7 = scmp.lt.s32.totalorder %s1454_s2, %s1447_s1 }
  0x6b   : > { %p1450_p13 = pnand %p1448_p11, %p1436_p1 }
  0x6c   : > { %p1457_p8 = por %p1456_p7, %p1455_p4 }
  0x6d   : > { %p1451_p6 = pneg %p1450_p13 }
  0x6f   : > { %p1458_p10 = pnand %p1457_p8, %p1451_p6 }
  0x71   : > { %1461 = shalt.err (!%p1458_p10)
}
  0x72   : > { %1275 = dma.hbm_to_vmem [thread:$0]  (!%p2205_p12), %s2157_s0, 1024, %s1860_s29, [#allocation6], %s2204_s12, %s2204_s12, %s2203_s23  }
  0x73   : > { %s1154_s14 = sshll.u32 %s1790_s22, 3  ;;  %s1155_s6 = sshll.u32 %s1642_s9, 7 }
  0x74   : > { %s1925_s21 = scalar_lea.hbm %s2161_s4, %s1155_s6  ;;  %s393_s19 = scalar_lea.vmem [#allocation11], %s1154_s14 }
  0x75   : > { %s400_s27 = sshll.u32 %s393_s19, 4  ;;  %s390_s1 = scalar_lea.sflag [#allocation12], %s1790_s22  ;;  %s401_s27 = int_to_ptr.vmem [resolvable:$true] %s400_s27 }
  0x76   : > { %s1462_s2 = scalar_lea.hbm %s1925_s21, 128  ;;  %s1467_s12 = scalar_lea.hbm %s2161_s4, 256 }
  0x77   : > { %p1463_p1 = scmp.ne.s32.totalorder %s1925_s21, %s1462_s2  ;;  %p1468_p5 = scmp.lt.u32.totalorder %s1925_s21, %s2161_s4 }
  0x78   : > { %p1469_p9 = scmp.lt.u32.totalorder %s1467_s12, %s1462_s2  ;;  %p1471_p13 = scmp.lt.u32.totalorder %s1462_s2, %s1925_s21 }
  0x79   : > { %p1465_p2 = pnand %p1463_p1, %p1823_p3 }
  0x7a   : > { %p1470_p11 = por %p1469_p9, %p1468_p5 }
  0x7b   : > { %p1466_p12 = pneg %p1465_p2 }
  0x7c   : > { %p1472_p6 = por %p1471_p13, %p1470_p11 }
  0x7e   : > { %p1473_p4 = pnand %p1472_p6, %p1466_p12 }
  0x80   : > { %1476 = shalt.err (!%p1473_p4)
}
  0x81   : > { %s1477_s22 = scalar_lea.vmem %s401_s27, 128  ;;  %s1657_s14 = smov [#allocation11]  }
  0x82   : > { %p1478_p7 = scmp.ne.s32.totalorder %s401_s27, %s1477_s22  ;;  %s1482_s6 = sshll.u32 %s1657_s14, 4  ;;  %s1483_s6 = int_to_ptr.vmem [resolvable:$false] %s1482_s6 }
  0x83   : > { %s1484_s16 = scalar_lea.vmem %s1483_s6, 256  ;;  %p1485_p1 = scmp.lt.s32.totalorder %s401_s27, %s1483_s6 }
  0x84   : > { %p1480_p8 = pnand %p1478_p7, %p1823_p3  ;;  %p1486_p2 = scmp.lt.s32.totalorder %s1484_s16, %s1477_s22 }
  0x86   : > { %p1481_p10 = pneg %p1480_p8  ;;  %p1487_p0 = por %p1486_p2, %p1485_p1 }
  0x88   : > { %p1488_p5 = pnand %p1487_p0, %p1481_p10 }
  0x8a   : > { %1491 = shalt.err (!%p1488_p5)
}
  0x8b   : > { %p2206_p9 = scmp.ne.s32.totalorder %s2196_s13, 0  ;;  %p2207_p12 = scmp.ne.s32.totalorder %s2199_s24, 0 }
  0x8c   : > { %p2208_p11 = scmp.eq.s32.totalorder (!%p2207_p12), %s1745_s11, 0 }
  0x8d   : > { %1284 = dma.hbm_to_vmem [thread:$0]  (!%p2206_p9), %s1925_s21, 128, %s401_s27, %s390_s1  }
  0x8e   : > { %416 = sbr.rel (%p2207_p12) target bundleno = 1180 (0x49c), region = 44 }
  0x95   : > { %1605 = dma.done.wait (%p2208_p11), [#allocation6], 1024   ;;  %p2209_p3 = pmov %p2208_p11 }
  0x96   : > { %s427_s15 = sand.u32 1, %s1745_s11   ;;  %s1953_s26 = sand.u32 1, %s1630_s28  }
  0x97   : > { %1607 = vsyncadd (%p2209_p3), [#allocation6], 4294966272  ;;  %s1158_s13 = sshll.u32 %s1953_s26, 5  ;;  %s428_s21 = scalar_lea.sflag [#allocation9], %s427_s15 }
  0x98   : > { %s431_s19 = scalar_lea.vmem [#allocation8], %s1158_s13  ;;  %p2210_p0 = scmp.ne.s32.totalorder %s2190_s17, 0 }
  0x9a   : > { %1609 = dma.done.wait (%p2210_p0), %s428_s21, 1024  }
  0x9b   : > { %1611 = vsyncadd (%p2210_p0), %s428_s21, 4294966272  ;;  %s1963_s24 = sshll.u32 %s1953_s26, 3  ;;  %s1965_s27 = scalar_lea.vmem [#allocation10], %s1158_s13 }
  0x9c   : > { %s446_s1 = scalar_lea.sflag [#allocation12], %s1953_s26  ;;  %s449_s2 = scalar_lea.vmem [#allocation11], %s1963_s24 }
  0x9d   : > { %1613 = dma.done.wait (%p2210_p0), %s446_s1, 128  }
  0x9e   : > { %1615 = vsyncadd (%p2210_p0), %s446_s1, 4294967168  ;;  %s1161_s29 = sshll.u32 %s1953_s26, 6  ;;  %p519_p13 = scmp.lt.s32.totalorder %s1638_s30, 1  ;;  %vm536_vm0 = vcmask 261120   ;;  %v548_v0 = vld [vmem:[%s431_s19] sm:$0xff]  ;;  %v549_v1 = vld [vmem:[%s431_s19 + $0x8] sm:$0xff] }
  0x9f   : > { %v550_v2 = vld [vmem:[%s431_s19 + $0x10] sm:$0xff]  ;;  %v1238_v3 = vpack.c.bf16 %v549_v1, %v548_v0  ;;  %v551_v4 = vld [vmem:[%s431_s19 + $0x18] sm:$0xff]  ;;  %v535_v5 = vld [vmem:[%s449_s2] sm:$0xff]  ;;  %s1998_s16 = scalar_lea.vmem [#allocation13], %s1161_s29  ;;  %s506_s13 = scalar_lea.vmem [#allocation14], %s1963_s24 }
  0xa0   : > { %s1976_s23 = scalar_select %p519_p13, %s1638_s30, 1  ;;  %v540_v6 = vld [vmem:[#allocation5] sm:$0xff]  ;;  %v1242_v7 = vpack.c.bf16 %v551_v4, %v550_v2  ;;  %537 = vst.msk [vmem:[#allocation3] sm:$0xff] %vm536_vm0, %v535_v5  ;;  %v541_v10 = vld [vmem:[#allocation5 + $0x8] sm:$0xff]  ;;  %v542_v12 = vld [vmem:[#allocation5 + $0x10] sm:$0xff] }
  0xa1   : > { %1215 = vmatprep.mubr.msk.f32.mxu0 %vm536_vm0, %v540_v6  ;;  %1239 = vmatprep.subr.bf16.mxu0 %v1238_v3  ;;  %v544_v8 = vld [vmem:[#allocation5 + $0x20] sm:$0xff]  ;;  %v545_v11 = vld [vmem:[#allocation5 + $0x28] sm:$0xff]  ;;  %v546_v13 = vld [vmem:[#allocation5 + $0x30] sm:$0xff]  ;;  %s513_s21 = scalar_lea.vmem [#allocation16], %s1963_s24  ;;  %s2002_s19 = smov 0  }
  0xa2   : > { %s1164_s12 = sshll.u32 %s1976_s23, 3  ;;  %1252 = vmatprep.subr.bf16.mxu1 %v1238_v3  ;;  %1241 = vmatpush3.bf16.msra.mxu0 %v1238_v3  ;;  %v543_v14 = vld [vmem:[#allocation5 + $0x18] sm:$0xff]  ;;  %s521_s6 = scalar_lea.vmem %s2160_s3, %s1976_s23 }
  0xa3   : > { %s525_s25 = scalar_lea.vmem %s2162_s5, %s1164_s12  ;;  %1254 = vmatpush3.bf16.msra.mxu1 %v1238_v3  ;;  %1243 = vmatprep.subr.bf16.mxu0 %v1242_v7  ;;  %v547_v15 = vld [vmem:[#allocation5 + $0x38] sm:$0xff]  ;;  %v1173_v16 = vld [vmem:[%s521_s6] ss:$0 sm:$0xff] }
  0xa4   : > { %v538_v9 = vld [vmem:[%s525_s25] sm:$0xff]  ;;  %1253 = vmatprep.subr.bf16.mxu1 %v1242_v7  ;;  %1221 = vmatprep.mubr.msk.f32.mxu1 %vm536_vm0, %v544_v8 }
  0xa5   : > { %539 = vst.msk [vmem:[#allocation4] sm:$0xff] %vm536_vm0, %v538_v9 }
  0xa6   : > { %1245 = vmatpush3.bf16.msra.mxu0 %v1242_v7 }
  0xa7   : > { %1255 = vmatpush3.bf16.msra.mxu1 %v1242_v7 }
  0xa9   : > { %1216 = vmatmul.mubr.msk.f32.vlgmr.msra.gmra.mrb[0].mxu0 %vm536_vm0, %v541_v10 }
  0xaa   : > { %1222 = vmatmul.mubr.msk.f32.vlgmr.msra.gmra.mrb[0].mxu1 %vm536_vm0, %v545_v11  ;;  %1218 = vmatprep.mubr.msk.f32.mxu0 %vm536_vm0, %v542_v12 }
  0xab   : > { %1224 = vmatprep.mubr.msk.f32.mxu1 %vm536_vm0, %v546_v13 }
  0xad   : > { %1219 = vmatmul.mubr.msk.f32.gmra.mrb[2].mxu0 %vm536_vm0, %v543_v14 }
  0xae   : > { %1225 = vmatmul.mubr.msk.f32.gmra.mrb[2].mxu1 %vm536_vm0, %v547_v15 }
 0x17c   : > { %v1217_v17 = vpop.f32.mrb[0].mxu0 }
 0x17d   : > { %v1223_v18 = vpop.f32.mrb[0].mxu1  ;;  %v690_v19 = vadd.f32 %v1217_v17, %v1173_v16  ;;  %v643_v21 = vpop.f32.mrb[1].mxu0 }
 0x17e   : > { %v694_v20 = vadd.f32 %v1223_v18, %v1173_v16  ;;  %v663_v22 = vpop.f32.mrb[1].mxu1  ;;  %v689_v23 = vadd.f32 %v1173_v16, %v643_v21 }
 0x17f   : > { %v693_v24 = vadd.f32 %v1173_v16, %v663_v22  ;;  %698 = vst [vmem:[#allocation2 + $0x8] sm:$0xff] %v690_v19 }
 0x180   : > { %702 = vst [vmem:[#allocation2 + $0x28] sm:$0xff] %v694_v20  ;;  %697 = vst [vmem:[#allocation2] sm:$0xff] %v689_v23  ;;  %v1220_v25 = vpop.f32.mrb[2].mxu0 }
 0x181   : > { %701 = vst [vmem:[#allocation2 + $0x20] sm:$0xff] %v693_v24  ;;  %v1226_v26 = vpop.f32.mrb[2].mxu1  ;;  %v692_v27 = vadd.f32 %v1220_v25, %v1173_v16  ;;  %v653_v29 = vpop.f32.mrb[3].mxu0 }
 0x182   : > { %v696_v28 = vadd.f32 %v1226_v26, %v1173_v16  ;;  %v673_v30 = vpop.f32.mrb[3].mxu1  ;;  %v691_v31 = vadd.f32 %v1173_v16, %v653_v29 }
 0x183   : > { %v695_v32 = vadd.f32 %v1173_v16, %v673_v30  ;;  %700 = vst [vmem:[#allocation2 + $0x18] sm:$0xff] %v692_v27 }
 0x184   : > { %704 = vst [vmem:[#allocation2 + $0x38] sm:$0xff] %v696_v28  ;;  %699 = vst [vmem:[#allocation2 + $0x10] sm:$0xff] %v691_v31 }
 0x185   : > { %703 = vst [vmem:[#allocation2 + $0x30] sm:$0xff] %v695_v32 }
 0x186 LB: >> { %v719_v33 = vld [vmem:[%s1965_s27] sm:$0xff]  ;;  %v720_v34 = vld [vmem:[%s1965_s27 + $0x8] sm:$0xff]  ;;  %v721_v35 = vld [vmem:[%s1965_s27 + $0x10] sm:$0xff]  ;;  %v1658_v36 = vmov 0.0|0.0   ;;  %vm1659_vm1 = vmmov 0   ;;  %v1660_v39 = vmov 0.0   ;;  %s1650_s19 = sphi %s2002_s19, %s710_s19  }
 0x187   : >> { %1246 = vmatprep.subr.bf16.mxu0 %v1658_v36  ;;  %v1247_v37 = vpack.c.bf16 %v720_v34, %v719_v33  ;;  %v722_v38 = vld [vmem:[%s1965_s27 + $0x18] sm:$0xff]  ;;  %1235 = vmatprep.mubr.msk.f32.mxu0 %vm1659_vm1, %v1660_v39  ;;  %v715_v41 = vld [vmem:[#allocation3] sm:$0xff]  ;;  %s1174_s1 = sshll.u32 %s1650_s19, 1  ;;  %s1661_s17 = smov 64  }
 0x188   : >> { %v1250_v40 = vpack.c.bf16 %v722_v38, %v721_v35  ;;  %s712_s2 = ssub.s32 7, %s1174_s1  ;;  %v804_v47 = vld [vmem:[#allocation4] sm:$0xff]  ;;  %s1662_s25 = smov 32  }
 0x189   : >> { %1248 = vmatpush3.bf16.msra.mxu0 %v1247_v37  ;;  %s713_s29 = smul.u32 %s1638_s30, %s712_s2  ;;  %s1663_s22 = smov 96  }
 0x18a   : >> { %1249 = vmatprep.subr.bf16.mxu0 %v1658_v36 }
 0x18b   : >> { %s2015_s23 = sadd.s32 %s1650_s19, %s713_s29  ;;  %s710_s19 = sadd.s32 1, %s1650_s19  }
 0x18c   : >> { %s1175_s12 = sshll.u32 %s2015_s23, 3  ;;  %p707_p6 = scmp.ge.s32.totalorder %s710_s19, 8  }
 0x18d   : >> { %1251 = vmatpush3.bf16.msra.mxu0 %v1250_v40  ;;  %s717_s20 = scalar_lea.vmem [#allocation2], %s1175_s12  ;;  %s836_s14 = scalar_lea.vmem %s1998_s16, %s1175_s12 [#allocation13] }
 0x18e   : >> { %v718_v42 = vld [vmem:[%s717_s20] sm:$0xff]  ;;  %s1183_s6 = sshll.u32 (%p707_p6), %s1638_s30, 7  ;;  %s888_s27 = sshll.u32 (%p707_p6), %s506_s13, 4  ;;  %s2043_s27 = int_to_ptr.vmem [resolvable:$true] %s888_s27 }
 0x18f   : > { %s2039_s19 = scalar_lea.hbm (%p707_p6), %s2164_s7, %s1183_s6  ;;  %s2048_s12 = scalar_lea.hbm (%p707_p6), %s2165_s8, %s1183_s6 }
 0x190   : >> { %1236 = vmatmul.mubr.msk.f32.vlgmr.msra.gmra.mrb[0].mxu0 %vm536_vm0, %v715_v41  ;;  %s2052_s20 = scalar_lea.sflag (%p707_p6), [#allocation15], %s427_s15  ;;  %p2211_p7 = scmp.ne.s32.totalorder (%p707_p6), %s2191_s18, 0 }
 0x263   : >> { %v792_v43 = vpop.f32.mrb[0].mxu0 }
 0x264   : >> { %v796_v44 = vadd.f32 %v792_v43, %v718_v42  ;;  %v1237_v45 = vpop.f32.mrb[1].mxu0 }
 0x266   : >> { %1366 = vtanh.f32 %v796_v44  ;;  %v1177_v48 = vmul.f32 -1.442695, %v796_v44 }
 0x268   : >> { %1368 = vpow2.f32 %v1177_v48 }
 0x270   : >> { %v1367_v46 = vpop.eup %1366 }
 0x271   : >> { %811 = vrot.lane.b32.xlu0 %v1367_v46, %s1661_s17 }
 0x272   : >> { %v1369_v49 = vpop.eup %1368 }
 0x273   : >> { %v800_v50 = vadd.f32 1.0, %v1369_v49 }
 0x275   : >> { %806 = vrot.lane.b32.xlu0 %v804_v47, %s1662_s25  ;;  %1370 = vrcp.f32 %v800_v50 }
 0x27f   : >> { %v1371_v51 = vpop.eup %1370 }
 0x2e3   : >> { %v812_v52 = vpop.permute.xlu0 %811 }
 0x2e4   : >> { %v814_v53 = vmul.f32 %v1371_v51, %v812_v52 }
 0x2e6   : >> { %816 = vrot.lane.b32.xlu1 %v814_v53, %s1662_s25 }
 0x2e7   : >> { %v807_v54 = vpop.permute.xlu0 %806 }
 0x2e8   : >> { %v809_v55 = vmul.f32 %v1371_v51, %v807_v54 }
 0x358   : >> { %v817_v56 = vpop.permute.xlu1 %816 }
 0x359   : >> { %v819_v57 = vadd.f32 %v817_v56, %v809_v55 }
 0x35b   : >> { %1372 = vtanh.f32 %v819_v57  ;;  %827 = vrot.lane.b32.xlu0 %v819_v57, %s1663_s22 }
 0x365   : >> { %v1373_v58 = vpop.eup %1372 }
 0x366   : >> { %822 = vrot.lane.b32.xlu1 %v1373_v58, %s1661_s17  ;;  %s1492_s17 = scalar_lea.vmem (%p707_p6), %s2043_s27, 128 }
 0x367   : > { %p1493_p4 = scmp.ne.s32.totalorder (%p707_p6), %s2043_s27, %s1492_s17 }
 0x369   : > { %p1494_p8 = pnand (%p707_p6), %p1493_p4, %p2211_p7 }
 0x36b   : > { %p1495_p10 = pneg (%p707_p6), %p1494_p8 }
 0x3cd   : >> { %v828_v59 = vpop.permute.xlu0 %827 }
 0x3ce   : >> { %830 = vst.msk [vmem:[#allocation4] sm:$0xff] %vm536_vm0, %v828_v59 }
 0x3d5   : > { %v840_v0 = vld [vmem:[#allocation4] sm:$0xff] (%p707_p6) }
 0x3d6   : > { %841 = vst.msk [vmem:[%s513_s21] sm:$0xff] (%p707_p6), %vm536_vm0, %v840_v0 }
 0x3d8   : >> { %v823_v60 = vpop.permute.xlu1 %822 }
 0x3d9   : >> { %v825_v61 = vmul.f32 %v1371_v51, %v823_v60 }
 0x3db   : >> { %832 = vrot.lane.b32.xlu1 %v825_v61, %s1662_s25  ;;  %s1664_s25 = smov (%p707_p6), [#allocation14]  }
 0x448   : > { %709 = sbr.rel (!%p707_p6) target bundleno = 390 (0x186), region = 177 }
 0x44d   : >> { %v833_v62 = vpop.permute.xlu1 %832 }
 0x44e   : >> { %835 = vst.msk [vmem:[#allocation3] sm:$0xff] %vm536_vm0, %v833_v62  ;;  %837 = vst.msk [vmem:[%s836_s14] sm:$0xff] %vm536_vm0, %v833_v62 }
 0x455   : > { %v838_v63 = vld [vmem:[#allocation3] sm:$0xff] }
 0x456   : > { %839 = vst.msk [vmem:[%s506_s13] sm:$0xff] %vm536_vm0, %v838_v63  ;;  %s1496_s13 = sshll.u32 %s1664_s25, 4  ;;  %s1497_s13 = int_to_ptr.vmem [resolvable:$false] %s1496_s13 }
 0x457   : > { %s1498_s22 = scalar_lea.vmem %s1497_s13, 256  ;;  %p1499_p1 = scmp.lt.s32.totalorder %s2043_s27, %s1497_s13 }
 0x458   : > { %p1500_p2 = scmp.lt.s32.totalorder %s1498_s22, %s1492_s17 }
 0x45a   : > { %p1501_p5 = por %p1500_p2, %p1499_p1 }
 0x45c   : > { %p1502_p9 = pnand %p1501_p5, %p1495_p10 }
 0x45e   : > { %1505 = shalt.err (!%p1502_p9)
}
 0x45f   : > { %s1506_s11 = scalar_lea.hbm %s2039_s19, 128  ;;  %s1510_s6 = scalar_lea.hbm %s2164_s7, 256 }
 0x460   : > { %p1507_p12 = scmp.ne.s32.totalorder %s2039_s19, %s1506_s11  ;;  %p1511_p0 = scmp.lt.u32.totalorder %s2039_s19, %s2164_s7 }
 0x461   : > { %p1512_p13 = scmp.lt.u32.totalorder %s1510_s6, %s1506_s11  ;;  %p1514_p4 = scmp.lt.u32.totalorder %s1506_s11, %s2039_s19 }
 0x462   : > { %p1508_p11 = pnand %p1507_p12, %p2211_p7 }
 0x463   : > { %p1513_p6 = por %p1512_p13, %p1511_p0 }
 0x464   : > { %p1509_p3 = pneg %p1508_p11 }
 0x465   : > { %p1515_p8 = por %p1514_p4, %p1513_p6 }
 0x467   : > { %p1516_p10 = pnand %p1515_p8, %p1509_p3 }
 0x469   : > { %1519 = shalt.err (!%p1516_p10)
}
 0x46a   : > { %1267 = dma.vmem_to_hbm [thread:$0]  (%p2211_p7), %s2043_s27, 128, %s2039_s19, %s2052_s20  }
 0x46b   : > { %s1189_s29 = sshll.u32 %s1638_s30, 10  ;;  %s2212_s25 = sld [smem:[#allocation29_spill]] }
 0x46c   : > { %s872_s22 = sshll.u32 %s1998_s16, 4  ;;  %s2087_s11 = sshll.u32 %s513_s21, 4  ;;  %s2083_s22 = int_to_ptr.vmem [resolvable:$true] %s872_s22  ;;  %s902_s11 = int_to_ptr.vmem [resolvable:$true] %s2087_s11 }
 0x46d   : > { %s843_s15 = scalar_lea.sflag [#allocation7], %s1953_s26  ;;  %s1520_s14 = scalar_lea.vmem %s2083_s22, 1024 }
 0x46e   : > { %p1521_p1 = scmp.ne.s32.totalorder %s2083_s22, %s1520_s14  ;;  %s1665_s30 = smov [#allocation13]  }
 0x46f   : > { %s1524_s19 = sshll.u32 %s1665_s30, 4  ;;  %s1525_s19 = int_to_ptr.vmem [resolvable:$false] %s1524_s19 }
 0x470   : > { %p1522_p2 = pnand %p1521_p1, %p2211_p7  ;;  %s1526_s27 = scalar_lea.vmem %s1525_s19, 2048 }
 0x471   : > { %s2080_s13 = scalar_lea.hbm %s2212_s25, %s1189_s29  ;;  %p1527_p9 = scmp.lt.s32.totalorder %s2083_s22, %s1525_s19 }
 0x472   : > { %p1523_p5 = pneg %p1522_p2  ;;  %p1528_p12 = scmp.lt.s32.totalorder %s1526_s27, %s1520_s14 }
 0x474   : > { %p1529_p11 = por %p1528_p12, %p1527_p9 }
 0x476   : > { %p1530_p3 = pnand %p1529_p11, %p1523_p5 }
 0x478   : > { %1533 = shalt.err (!%p1530_p3)
}
 0x479   : > { %s1534_s24 = scalar_lea.hbm %s2080_s13, 1024  ;;  %s1538_s6 = scalar_lea.hbm %s2212_s25, 2048 }
 0x47a   : > { %p1535_p0 = scmp.ne.s32.totalorder %s2080_s13, %s1534_s24  ;;  %p1539_p4 = scmp.lt.u32.totalorder %s2080_s13, %s2212_s25 }
 0x47b   : > { %p1540_p8 = scmp.lt.u32.totalorder %s1538_s6, %s1534_s24  ;;  %p1542_p1 = scmp.lt.u32.totalorder %s1534_s24, %s2080_s13 }
 0x47c   : > { %p1536_p13 = pnand %p1535_p0, %p2211_p7 }
 0x47d   : > { %p1541_p10 = por %p1540_p8, %p1539_p4 }
 0x47e   : > { %p1537_p6 = pneg %p1536_p13 }
 0x47f   : > { %p1543_p2 = por %p1542_p1, %p1541_p10 }
 0x481   : > { %p1544_p5 = pnand %p1543_p2, %p1537_p6 }
 0x483   : > { %1547 = shalt.err (!%p1544_p5)
}
 0x484   : > { %s1666_s29 = smov 128   ;;  %s1667_s23 = smov 8  }
 0x485   : > { %1266 = dma.vmem_to_hbm [thread:$0]  (%p2211_p7), %s2083_s22, 1024, %s2080_s13, %s843_s15, %s1666_s29, %s1666_s29, %s1667_s23  }
 0x486   : > { %s1548_s17 = scalar_lea.vmem %s902_s11, 128  ;;  %s1668_s14 = smov [#allocation16]  }
 0x487   : > { %p1549_p9 = scmp.ne.s32.totalorder %s902_s11, %s1548_s17  ;;  %s1552_s30 = sshll.u32 %s1668_s14, 4  ;;  %s1553_s30 = int_to_ptr.vmem [resolvable:$false] %s1552_s30 }
 0x488   : > { %s1554_s19 = scalar_lea.vmem %s1553_s30, 256  ;;  %p1555_p3 = scmp.lt.s32.totalorder %s902_s11, %s1553_s30 }
 0x489   : > { %p1550_p12 = pnand %p1549_p9, %p2211_p7  ;;  %p1556_p0 = scmp.lt.s32.totalorder %s1554_s19, %s1548_s17 }
 0x48b   : > { %p1551_p11 = pneg %p1550_p12  ;;  %p1557_p13 = por %p1556_p0, %p1555_p3 }
 0x48d   : > { %p1558_p6 = pnand %p1557_p13, %p1551_p11 }
 0x48f   : > { %1561 = shalt.err (!%p1558_p6)
}
 0x490   : > { %s1562_s26 = scalar_lea.hbm %s2048_s12, 128  ;;  %s1566_s15 = scalar_lea.hbm %s2165_s8, 256 }
 0x491   : > { %p1563_p4 = scmp.ne.s32.totalorder %s2048_s12, %s1562_s26  ;;  %p1567_p1 = scmp.lt.u32.totalorder %s2048_s12, %s2165_s8 }
 0x492   : > { %p1568_p2 = scmp.lt.u32.totalorder %s1566_s15, %s1562_s26  ;;  %p1570_p9 = scmp.lt.u32.totalorder %s1562_s26, %s2048_s12 }
 0x493   : > { %p1564_p8 = pnand %p1563_p4, %p2211_p7 }
 0x494   : > { %p1569_p5 = por %p1568_p2, %p1567_p1 }
 0x495   : > { %p1565_p10 = pneg %p1564_p8 }
 0x496   : > { %p1571_p12 = por %p1570_p9, %p1569_p5 }
 0x498   : > { %p1572_p11 = pnand %p1571_p12, %p1565_p10 }
 0x49a   : > { %1575 = shalt.err (!%p1572_p11)
}
 0x49b   : > { %1268 = dma.vmem_to_hbm [thread:$0]  (%p2211_p7), %s902_s11, 128, %s2048_s12, %s2052_s20  }
 0x49c PF: > { %s2213_s16 = sld [smem:[#allocation22_spill]]  ;;  %s2214_s21 = sld [smem:[#allocation26_spill]] }
 0x49d   : > { %p2216_p0 = scmp.ge.s32.totalorder %s1646_s10, 2 }
 0x4a2   : > { %s913_s6 = sand.u32 1, %s2213_s16   ;;  %p2215_p3 = scmp.ne.s32.totalorder %s2214_s21, 0 }
 0x4a3   : > { %s914_s1 = scalar_lea.sflag [#allocation7], %s913_s6 }
 0x4a4   : > { %p1286_p13 = pnand %p2216_p0, %p2215_p3 }
 0x4a6   : > { %1617 = dma.done.wait (!%p1286_p13), %s914_s1, 1024  }
 0x4a7   : > { %1619 = vsyncadd (!%p1286_p13), %s914_s1, 4294966272  ;;  %s2217_s2 = sadd.s32 4294967294, %s1646_s10  }
 0x4a8   : > { %s922_s29 = sand.u32 1, %s2217_s2  }
 0x4a9   : > { %s923_s23 = scalar_lea.sflag [#allocation15], %s922_s29 }
 0x4aa   : > { %1621 = dma.done.wait (!%p1286_p13), %s923_s23, 256  }
 0x4ab   : > { %1623 = vsyncadd (!%p1286_p13), %s923_s23, 4294967040  ;;  %s34_s10 = sadd.s32 1, %s1646_s10   ;;  %s2218_s18 = sld [smem:[#allocation23_spill]] }
 0x4ac   : > { %p31_p7 = scmp.ge.s32.totalorder %s34_s10, 4   ;;  %s2219_s29 = sld [smem:[#allocation25_spill]] }
 0x4ad   : > { %s2220_s12 = sld [smem:[#allocation24_spill]]  ;;  %s2221_s27 = smov %s1630_s28 }
 0x4ae   : > { %s2223_s30 = smov %s1642_s9  ;;  %33 = sbr.rel (!%p31_p7) target bundleno = 16 (0x10), region = 188 }
 0x4b1   : > { %s2222_s28 = smov %s2218_s18 }
 0x4b3   : > { %s2224_s9 = smov %s2220_s12 }
 0x4b5   :  { %937 = vsyncpa [#allocation6], 1 }
 0x4b6   :  { %939 = vsyncpa [#allocation6 + $0x1], 1 }
 0x4b7   :  { %940 = vsyncpa [#allocation9], 1 }
 0x4b8   :  { %942 = vsyncpa [#allocation9 + $0x1], 1 }
 0x4b9   :  { %943 = vsyncpa [#allocation12], 1 }
 0x4ba   :  { %945 = vsyncpa [#allocation12 + $0x1], 1 }
 0x4bb   :  { %946 = vsyncpa [#allocation7], 1 }
 0x4bc   :  { %948 = vsyncpa [#allocation7 + $0x1], 1 }
 0x4bd   :  { %949 = vsyncpa [#allocation15], 1 }
 0x4be   :  { %951 = vsyncpa [#allocation15 + $0x1], 1 }

</bundles_post_ra>
